<compile_context>
chip_gen: v7x
topology: tpu7x:2x2x1
jax: 0.10.0
libtpu: 0.0.40
codegen_flags: <defaults>
</compile_context>

<pallas_src>
import jax
import jax.numpy as jnp
from jax.experimental import pallas as pl
from jax.experimental.pallas import tpu as pltpu

# (row, col) position of the +1 tap in each of the 8 fixed 3x3 kernels
# (the -1 tap is always at the center (1, 1)).
_PLUS_OFFSETS = ((0, 0), (0, 1), (0, 2),
                 (1, 0),         (1, 2),
                 (2, 0), (2, 1), (2, 2))

_VMEM_BLOCK_BUDGET = 1 * 1024 * 1024   # bytes per input block (leaves headroom on v7x)
_MAX_PACKED_W = 512                    # target packed lane width


def _choose_pack_factor(B, W):
    """How many images to pack side-by-side along W (the lane axis)."""
    if W >= 128:
        return 1
    g = 1
    for cand in range(1, B + 1):
        if B % cand == 0 and cand * W <= _MAX_PACKED_W:
            g = cand
    return g


def _choose_batch_tile(Bp, H, Wp, itemsize):
    """Largest divisor of Bp whose input block fits the per-block VMEM budget."""
    per_slab = H * Wp * itemsize
    bt = 1
    for cand in range(1, Bp + 1):
        if Bp % cand == 0 and cand * per_slab <= _VMEM_BLOCK_BUDGET:
            bt = cand
    return bt


def _pack_lanes(x, G):
    """(B, H, W) -> (B//G, H, G*W): G images packed side-by-side along lanes."""
    B, H, W = x.shape
    if G == 1:
        return x
    return (x.reshape(B // G, G, H, W)
             .transpose(0, 2, 1, 3)
             .reshape(B // G, H, G * W))


def _make_kernel(W_img, G, H, Wp):
    Ho = H - 2
    Wo_p = Wp - 2          # packed output width (seam columns masked below)

    def kernel(out_ref, label_ref, partial_ref):
        # Factor the difference once: contrast(out) - contrast(label) == contrast(out - label).
        e = out_ref[...].astype(jnp.float32) - label_ref[...].astype(jnp.float32)

        # Hoist the 3 column(lane)-shifted slabs; reuse them for all row offsets.
        slabs = (e[:, :, 0:Wo_p], e[:, :, 1:1 + Wo_p], e[:, :, 2:2 + Wo_p])
        ec = slabs[1][:, 1:1 + Ho, :]            # center tap (-1), shared by all 8 kernels

        # Elementwise accumulation of d^2 over the 8 offsets (VALU only, no reductions).
        s = None
        for (r, c) in _PLUS_OFFSETS:
            d = slabs[c][:, r:r + Ho, :] - ec
            sq = d * d
            s = sq if s is None else s + sq

        if G > 1:
            # Mask output columns whose 3x3 window would straddle two packed images.
            col = jax.lax.broadcasted_iota(jnp.int32, s.shape, dimension=2)
            w_in_img = (col + 1) % W_img
            valid = jnp.logical_and(w_in_img >= 1, w_in_img <= W_img - 2)
            s = jnp.where(valid, s, jnp.float32(0.0))

        # Single cross-lane reduction per grid step -> independent partial sum.
        partial_ref[0, 0] = jnp.sum(s)

    return kernel


def contrast_depth_loss(out, label):
    """out, label: (B, H, W) floating-point depth maps. Returns scalar f32 MSE loss."""
    assert out.shape == label.shape and out.ndim == 3
    B, H, W = out.shape
    assert H >= 3 and W >= 3, "3x3 valid conv needs H, W >= 3"

    G = _choose_pack_factor(B, W)
    xp = _pack_lanes(out, G)
    yp = _pack_lanes(label, G)
    Bp, _, Wp = xp.shape

    itemsize = jnp.dtype(xp.dtype).itemsize
    Bt = _choose_batch_tile(Bp, H, Wp, itemsize)
    n_steps = Bp // Bt

    partials = pl.pallas_call(
        _make_kernel(W, G, H, Wp),
        out_shape=jax.ShapeDtypeStruct((n_steps, 1), jnp.float32),
        grid_spec=pltpu.PrefetchScalarGridSpec(
            num_scalar_prefetch=0,
            grid=(n_steps,),
            in_specs=[
                pl.BlockSpec((Bt, H, Wp), lambda i: (i, 0, 0)),
                pl.BlockSpec((Bt, H, Wp), lambda i: (i, 0, 0)),
            ],
            out_specs=pl.BlockSpec((1, 1), lambda i: (i, 0),
                                   memory_space=pltpu.SMEM),
        ),
        compiler_params=pltpu.CompilerParams(
            dimension_semantics=("parallel",)),
    )(xp, yp)

    # MSELoss default reduction='mean' over (B, 8, H-2, W-2).
    denom = jnp.float32(B * 8 * (H - 2) * (W - 2))
    return jnp.sum(partials) / denom


def _reference_loss(out, label):
    """Pure-JAX reference (shifted-slice form of the 8 fixed 3x3 group convs)."""
    B, H, W = out.shape
    Ho, Wo = H - 2, W - 2

    def contrast(x):
        xc = x[:, 1:1 + Ho, 1:1 + Wo]
        return jnp.stack(
            [x[:, r:r + Ho, c:c + Wo] - xc for (r, c) in _PLUS_OFFSETS], axis=1)

    c_out = contrast(out.astype(jnp.float32))
    c_lab = contrast(label.astype(jnp.float32))
    return jnp.mean((c_out - c_lab) ** 2)


if __name__ == "__main__":
    key = jax.random.PRNGKey(0)
    k1, k2 = jax.random.split(key)
    B, H, W = 2, 16, 16
    out = jax.random.uniform(k1, (B, H, W), dtype=jnp.float32)
    label = jax.random.uniform(k2, (B, H, W), dtype=jnp.float32)

    loss = contrast_depth_loss(out, label)
    jax.block_until_ready(loss)

    ref = _reference_loss(out, label)
    assert jnp.allclose(loss, ref, rtol=1e-5, atol=1e-6), (loss, ref)
    print("KERNEL_OK")
</pallas_src>

<mosaic_0001>
module attributes {stable_mosaic.version = 11 : i64} {
  func.func @kernel(%arg0: i32, %arg1: memref<1x16x32xf32, #tpu.memory_space<vmem>>, %arg2: memref<1x16x32xf32, #tpu.memory_space<vmem>>, %arg3: memref<1x1xf32, #tpu.memory_space<smem>>) attributes {dimension_semantics = [#tpu.dimension_semantics<parallel>], iteration_bounds = array<i64: 1>, scalar_prefetch = 0 : i64, scratch_operands = 0 : i64, tpu.core_type = #tpu.core_type<tc>, window_params = [{transform_indices = @transform_0, window_bounds = array<i64: 1, 16, 32>}, {transform_indices = @transform_1, window_bounds = array<i64: 1, 16, 32>}, {transform_indices = @transform_2, window_bounds = array<i64: 1, 1>}]} {
    %c0 = arith.constant 0 : index
    %c0_0 = arith.constant 0 : index
    %c0_1 = arith.constant 0 : index
    %0 = vector.load %arg1[%c0, %c0_0, %c0_1] : memref<1x16x32xf32, #tpu.memory_space<vmem>>, vector<1x16x32xf32>
    %c0_2 = arith.constant 0 : index
    %c0_3 = arith.constant 0 : index
    %c0_4 = arith.constant 0 : index
    %1 = vector.load %arg2[%c0_2, %c0_3, %c0_4] : memref<1x16x32xf32, #tpu.memory_space<vmem>>, vector<1x16x32xf32>
    %2 = arith.subf %0, %1 : vector<1x16x32xf32>
    %3 = vector.extract_strided_slice %2 {offsets = [0, 0, 0], sizes = [1, 16, 30], strides = [1, 1, 1]} : vector<1x16x32xf32> to vector<1x16x30xf32>
    %4 = vector.extract_strided_slice %2 {offsets = [0, 0, 1], sizes = [1, 16, 30], strides = [1, 1, 1]} : vector<1x16x32xf32> to vector<1x16x30xf32>
    %5 = vector.extract_strided_slice %2 {offsets = [0, 0, 2], sizes = [1, 16, 30], strides = [1, 1, 1]} : vector<1x16x32xf32> to vector<1x16x30xf32>
    %6 = vector.extract_strided_slice %4 {offsets = [0, 1, 0], sizes = [1, 14, 30], strides = [1, 1, 1]} : vector<1x16x30xf32> to vector<1x14x30xf32>
    %7 = vector.extract_strided_slice %3 {offsets = [0, 0, 0], sizes = [1, 14, 30], strides = [1, 1, 1]} : vector<1x16x30xf32> to vector<1x14x30xf32>
    %8 = arith.subf %7, %6 : vector<1x14x30xf32>
    %9 = arith.mulf %8, %8 : vector<1x14x30xf32>
    %10 = vector.extract_strided_slice %4 {offsets = [0, 0, 0], sizes = [1, 14, 30], strides = [1, 1, 1]} : vector<1x16x30xf32> to vector<1x14x30xf32>
    %11 = arith.subf %10, %6 : vector<1x14x30xf32>
    %12 = arith.mulf %11, %11 : vector<1x14x30xf32>
    %13 = arith.addf %9, %12 : vector<1x14x30xf32>
    %14 = vector.extract_strided_slice %5 {offsets = [0, 0, 0], sizes = [1, 14, 30], strides = [1, 1, 1]} : vector<1x16x30xf32> to vector<1x14x30xf32>
    %15 = arith.subf %14, %6 : vector<1x14x30xf32>
    %16 = arith.mulf %15, %15 : vector<1x14x30xf32>
    %17 = arith.addf %13, %16 : vector<1x14x30xf32>
    %18 = vector.extract_strided_slice %3 {offsets = [0, 1, 0], sizes = [1, 14, 30], strides = [1, 1, 1]} : vector<1x16x30xf32> to vector<1x14x30xf32>
    %19 = arith.subf %18, %6 : vector<1x14x30xf32>
    %20 = arith.mulf %19, %19 : vector<1x14x30xf32>
    %21 = arith.addf %17, %20 : vector<1x14x30xf32>
    %22 = vector.extract_strided_slice %5 {offsets = [0, 1, 0], sizes = [1, 14, 30], strides = [1, 1, 1]} : vector<1x16x30xf32> to vector<1x14x30xf32>
    %23 = arith.subf %22, %6 : vector<1x14x30xf32>
    %24 = arith.mulf %23, %23 : vector<1x14x30xf32>
    %25 = arith.addf %21, %24 : vector<1x14x30xf32>
    %26 = vector.extract_strided_slice %3 {offsets = [0, 2, 0], sizes = [1, 14, 30], strides = [1, 1, 1]} : vector<1x16x30xf32> to vector<1x14x30xf32>
    %27 = arith.subf %26, %6 : vector<1x14x30xf32>
    %28 = arith.mulf %27, %27 : vector<1x14x30xf32>
    %29 = arith.addf %25, %28 : vector<1x14x30xf32>
    %30 = vector.extract_strided_slice %4 {offsets = [0, 2, 0], sizes = [1, 14, 30], strides = [1, 1, 1]} : vector<1x16x30xf32> to vector<1x14x30xf32>
    %31 = arith.subf %30, %6 : vector<1x14x30xf32>
    %32 = arith.mulf %31, %31 : vector<1x14x30xf32>
    %33 = arith.addf %29, %32 : vector<1x14x30xf32>
    %34 = vector.extract_strided_slice %5 {offsets = [0, 2, 0], sizes = [1, 14, 30], strides = [1, 1, 1]} : vector<1x16x30xf32> to vector<1x14x30xf32>
    %35 = arith.subf %34, %6 : vector<1x14x30xf32>
    %36 = arith.mulf %35, %35 : vector<1x14x30xf32>
    %37 = arith.addf %33, %36 : vector<1x14x30xf32>
    %38 = tpu.iota {dimensions = array<i32: 2>} : vector<1x14x30xi32>
    %c1_i32 = arith.constant 1 : i32
    %39 = vector.broadcast %c1_i32 : i32 to vector<1x14x30xi32>
    %40 = arith.addi %38, %39 : vector<1x14x30xi32>
    %c16_i32 = arith.constant 16 : i32
    %c0_i32 = arith.constant 0 : i32
    %41 = arith.cmpi eq, %c16_i32, %c0_i32 : i32
    %c1_i32_5 = arith.constant 1 : i32
    %42 = arith.select %41, %c1_i32_5, %c16_i32 : i32
    %43 = vector.broadcast %42 : i32 to vector<1x14x30xi32>
    %44 = arith.remsi %40, %43 : vector<1x14x30xi32>
    %c0_i32_6 = arith.constant 0 : i32
    %45 = vector.broadcast %c0_i32_6 : i32 to vector<1x14x30xi32>
    %46 = arith.cmpi ne, %44, %45 : vector<1x14x30xi32>
    %c0_i32_7 = arith.constant 0 : i32
    %47 = vector.broadcast %c0_i32_7 : i32 to vector<1x14x30xi32>
    %48 = arith.cmpi slt, %44, %47 : vector<1x14x30xi32>
    %c0_i32_8 = arith.constant 0 : i32
    %49 = arith.cmpi slt, %42, %c0_i32_8 : i32
    %50 = vector.broadcast %49 : i1 to vector<1x14x30xi1>
    %51 = vector.broadcast %50 : vector<1x14x30xi1> to vector<1x14x30xi1>
    %52 = arith.xori %48, %51 : vector<1x14x30xi1>
    %53 = arith.andi %52, %46 : vector<1x14x30xi1>
    %54 = vector.broadcast %42 : i32 to vector<1x14x30xi32>
    %55 = arith.addi %44, %54 : vector<1x14x30xi32>
    %56 = arith.select %53, %55, %44 : vector<1x14x30xi1>, vector<1x14x30xi32>
    %c1_i32_9 = arith.constant 1 : i32
    %57 = vector.broadcast %c1_i32_9 : i32 to vector<1x14x30xi32>
    %58 = arith.cmpi sge, %56, %57 : vector<1x14x30xi32>
    %c14_i32 = arith.constant 14 : i32
    %59 = vector.broadcast %c14_i32 : i32 to vector<1x14x30xi32>
    %60 = arith.cmpi sle, %56, %59 : vector<1x14x30xi32>
    %61 = arith.andi %58, %60 : vector<1x14x30xi1>
    %cst = arith.constant 0.000000e+00 : f32
    %62 = vector.broadcast %cst : f32 to vector<1x14x30xf32>
    %63 = arith.select %61, %37, %62 : vector<1x14x30xi1>, vector<1x14x30xf32>
    %64 = vector.shape_cast %63 : vector<1x14x30xf32> to vector<1x1x14x30xf32>
    %cst_10 = arith.constant dense<0.000000e+00> : vector<1xf32>
    %65 = vector.multi_reduction <add>, %64, %cst_10 [1, 2, 3] : vector<1x1x14x30xf32> to vector<1xf32>
    %66 = vector.shape_cast %65 : vector<1xf32> to vector<1x1x1x1xf32>
    %67 = vector.extract %66[0, 0, 0, 0] : f32 from vector<1x1x1x1xf32>
    %c0_11 = arith.constant 0 : index
    %c0_12 = arith.constant 0 : index
    %68 = memref.load %arg3[%c0_11, %c0_12] : memref<1x1xf32, #tpu.memory_space<smem>>
    memref.store %67, %arg3[%c0_11, %c0_12] : memref<1x1xf32, #tpu.memory_space<smem>>
    return
  }
  func.func @transform_0(%arg0: i32) -> (i32, i32, i32) {
    %c0_i32 = arith.constant 0 : i32
    %c0_i32_0 = arith.constant 0 : i32
    %c0_i32_1 = arith.constant 0 : i32
    return %arg0, %c0_i32, %c0_i32_0 : i32, i32, i32
  }
  func.func @transform_1(%arg0: i32) -> (i32, i32, i32) {
    %c0_i32 = arith.constant 0 : i32
    %c0_i32_0 = arith.constant 0 : i32
    %c0_i32_1 = arith.constant 0 : i32
    return %arg0, %c0_i32, %c0_i32_0 : i32, i32, i32
  }
  func.func @transform_2(%arg0: i32) -> (i32, i32) {
    %c0_i32 = arith.constant 0 : i32
    %c0_i32_0 = arith.constant 0 : i32
    return %arg0, %c0_i32 : i32, i32
  }
}

</mosaic_0001>

<bundles_post_ra>
// kernel: tpu_custom_call.1
= control target key start
LH: loop header
LB: loop body
LE: loop exit
PB: predicated region body
PF: predicated region fallthrough
CT: control target
= control target key end

     0   :  { %7 = vsyncpa [#allocation3], 0  ;;  %s430_s0 = inlined_call_operand.hbm [shape: f32[1,16,32], index: 0, kind: input, shape index: {}]   ;;  %s431_s1 = inlined_call_operand.hbm [shape: f32[1,16,32], index: 1, kind: input, shape index: {}]   ;;  %s432_s2 = inlined_call_operand.hbm [shape: f32[1,1], index: 2, kind: output, shape index: {}]  }
   0x1   :  { %8 = vsyncpa [#allocation6], 0 }
   0x2   :  { %9 = vsyncpa [#allocation4], 0  ;;  %s327_s9 = smov [#allocation2]   ;;  %s267_s13 = scalar_lea.hbm %s430_s0, 256 }
   0x3   :  { %s15_s10 = sshll.u32 %s327_s9, 4  ;;  %p268_p0 = scmp.ne.s32.totalorder %s430_s0, %s267_s13  ;;  %s16_s10 = int_to_ptr.vmem [resolvable:$true] %s15_s10 }
   0x4   :  { %p271_p1 = scmp.lt.u32.totalorder %s267_s13, %s430_s0 }
   0x6   :  { %p273_p2 = pnand %p271_p1, %p268_p0 }
   0x8   :  { %276 = shalt.err (!%p273_p2)
}
   0x9   :  { %s277_s18 = scalar_lea.vmem %s16_s10, 256  ;;  %p282_p4 = scmp.lt.s32.totalorder %s16_s10, %s16_s10 }
   0xa   :  { %p278_p3 = scmp.ne.s32.totalorder %s16_s10, %s277_s18  ;;  %p283_p5 = scmp.lt.s32.totalorder %s277_s18, %s277_s18 }
   0xc   :  { %p284_p6 = por %p283_p5, %p282_p4 }
   0xe   :  { %p285_p7 = pnand %p284_p6, %p278_p3 }
  0x10   :  { %288 = shalt.err (!%p285_p7)
}
  0x11   :  { %s328_s19 = smov 128   ;;  %s329_s20 = smov 8  }
  0x12   :  { %21 = dma.hbm_to_vmem [thread:$0]  %s430_s0, 256, %s16_s10, [#allocation3], %s328_s19, %s328_s19, %s329_s20  }
  0x13   :  { %s330_s23 = smov [#allocation5]   ;;  %s289_s27 = scalar_lea.hbm %s431_s1, 256 }
  0x14   :  { %s27_s24 = sshll.u32 %s330_s23, 4  ;;  %p290_p8 = scmp.ne.s32.totalorder %s431_s1, %s289_s27  ;;  %s28_s24 = int_to_ptr.vmem [resolvable:$true] %s27_s24 }
  0x15   :  { %p293_p9 = scmp.lt.u32.totalorder %s289_s27, %s431_s1 }
  0x17   :  { %p295_p10 = pnand %p293_p9, %p290_p8 }
  0x19   :  { %298 = shalt.err (!%p295_p10)
}
  0x1a   :  { %s299_s4 = scalar_lea.vmem %s28_s24, 256  ;;  %p304_p12 = scmp.lt.s32.totalorder %s28_s24, %s28_s24 }
  0x1b   :  { %p300_p11 = scmp.ne.s32.totalorder %s28_s24, %s299_s4  ;;  %p305_p13 = scmp.lt.s32.totalorder %s299_s4, %s299_s4 }
  0x1d   :  { %p306_p0 = por %p305_p13, %p304_p12 }
  0x1f   :  { %p307_p1 = pnand %p306_p0, %p300_p11 }
  0x21   :  { %310 = shalt.err (!%p307_p1)
}
  0x22   :  { %33 = dma.hbm_to_vmem [thread:$0]  %s431_s1, 256, %s28_s24, [#allocation6], %s328_s19, %s328_s19, %s329_s20  }
  0x23   :  { %321 = dma.done.wait [#allocation3], 256  }
  0x24   :  { %322 = vsyncadd [#allocation3], 4294967040 }
  0x25   :  { %323 = dma.done.wait [#allocation6], 256  }
  0x26   :  { %324 = vsyncadd [#allocation6], 4294967040  ;;  %v40_v0 = vld [vmem:[#allocation2] sm:$0xff]  ;;  %v41_v1 = vld [vmem:[#allocation2 + $0x8] sm:$0xff]  ;;  %s331_s6 = smov 1   ;;  %vm48_vm0 = vcmask 1046528  }
  0x27   :  { %v42_v2 = vld [vmem:[#allocation5] sm:$0xff]  ;;  %v43_v3 = vld [vmem:[#allocation5 + $0x8] sm:$0xff]  ;;  %vm140_vm1 = vcmask 1040384   ;;  %vm156_vm2 = vcmask 1045504   ;;  %s332_s1 = smov 127   ;;  %s333_s7 = smov 126  }
  0x28   :  { %v374_v4 = vsub.f32 %v40_v0, %v42_v2  ;;  %v376_v5 = vsub.f32 %v41_v1, %v43_v3  ;;  %v206_v0 = vlaneseq  ;;  %vm226_vm6 = vcmask 244736   ;;  %s311_s11 = scalar_lea.hbm %s432_s2, 16 }
  0x29   :  { %vm228_vm7 = vcmask 242688   ;;  %p312_p2 = scmp.ne.s32.totalorder %s432_s2, %s311_s11  ;;  %p315_p3 = scmp.lt.u32.totalorder %s311_s11, %s432_s2 }
  0x2a   :  { %117 = vrot.lane.b32.xlu1 %v374_v4, %s331_s6  ;;  %v49_v6 = vrot.slane %v374_v4, 1  ;;  %v141_v7 = vrot.slane %v374_v4, 7  ;;  %v50_v8 = vrot.slane %v376_v5, 1  ;;  %v142_v9 = vrot.slane %v376_v5, 7 }
  0x2b   :  { %p317_p4 = pnand %p315_p3, %p312_p2 }
  0x2c   :  { %v166_v10 = vsub.f32 %v374_v4, %v141_v7  ;;  %v51_v11 = vsel %vm48_vm0, %v49_v6, %v50_v8  ;;  %v143_v12 = vsel %vm140_vm1, %v141_v7, %v142_v9  ;;  %v65_v19 = vsub.f32 %v376_v5, %v50_v8 }
  0x2d   :  { %78 = vrot.lane.b32.xlu0 %v51_v11, %s331_s6  ;;  %v167_v13 = vsub.f32 %v376_v5, %v143_v12  ;;  %v64_v20 = vsub.f32 %v374_v4, %v51_v11  ;;  %v207_v9 = vand.u32 127, %v206_v0 }
  0x2e   :  { %119 = vrot.lane.b32.xlu1 %v376_v5, %s331_s6  ;;  %v168_v14 = vmul.f32 %v166_v10, %v166_v10  ;;  %v67_v21 = vmul.f32 %v65_v19, %v65_v19 }
  0x2f   :  { %v169_v15 = vmul.f32 %v167_v13, %v167_v13  ;;  %v66_v22 = vmul.f32 %v64_v20, %v64_v20 }
  0x30   :  { %v172_v16 = vrot.slane %v168_v14, 2 }
  0x31   :  { %80 = vrot.lane.b32.xlu0 %v50_v8, %s331_s6  ;;  %v173_v17 = vrot.slane %v169_v15, 2 }
  0x32   :  { %185 = vrot.lane.b32.xlu1 %v143_v12, %s331_s6 }
  0x33   :  { %v174_v18 = vsel %vm156_vm2, %v172_v16, %v173_v17  ;;  %v208_v16 = vadd.s32 1, %v207_v9 }
  0x35   :  { %183 = vrot.lane.b32.xlu0 %v141_v7, %s331_s6 }
  0x36   :  { %54 = vrot.lane.b32.xlu1 %v50_v8, %s332_s1 }
  0x39   :  { %52 = vrot.lane.b32.xlu0 %v51_v11, %s332_s1 }
  0x3a   :  { %100 = vrot.lane.b32.xlu1 %v376_v5, %s332_s1 }
  0x3d   :  { %98 = vrot.lane.b32.xlu0 %v374_v4, %s332_s1 }
  0x3e   :  { %72 = vrot.lane.b32.xlu1 %v67_v21, %s332_s1 }
  0x41   :  { %70 = vrot.lane.b32.xlu0 %v66_v22, %s332_s1 }
  0x42   :  { %146 = vrot.lane.b32.xlu1 %v143_v12, %s332_s1 }
  0x45   :  { %144 = vrot.lane.b32.xlu0 %v141_v7, %s332_s1 }
  0x9c   :  { %v118_v23 = vpop.permute.xlu1 %117 }
  0x9d   :  { %v123_v24 = vsub.f32 %v374_v4, %v118_v23  ;;  %v213_v23 = vand.u32 15, %v208_v16 }
  0x9f   :  { %v125_v25 = vmul.f32 %v123_v24, %v123_v24  ;;  %v79_v26 = vpop.permute.xlu0 %78  ;;  %vm221_vm3 = vcmp.ge.s32.totalorder %v213_v23, 1  ;;  %vm222_vm4 = vcmp.le.s32.totalorder %v213_v23, 14 }
  0xa0   :  { %v120_v27 = vpop.permute.xlu1 %119  ;;  %v84_v28 = vsub.f32 %v374_v4, %v79_v26  ;;  %vm223_vm5 = vmand %vm221_vm3, %vm222_vm4 }
  0xa1   :  { %v124_v29 = vsub.f32 %v376_v5, %v120_v27  ;;  %v129_v30 = vrot.slane %v125_v25, 1 }
  0xa2   :  { %v86_v31 = vmul.f32 %v84_v28, %v84_v28 }
  0xa3   :  { %v126_v32 = vmul.f32 %v124_v29, %v124_v29  ;;  %v81_v33 = vpop.permute.xlu0 %80 }
  0xa4   :  { %v186_v34 = vpop.permute.xlu1 %185  ;;  %v85_v36 = vsub.f32 %v376_v5, %v81_v33  ;;  %90 = vrot.lane.b32.xlu0 %v86_v31, %s333_s7 }
  0xa5   :  { %v130_v35 = vrot.slane %v126_v32, 1  ;;  %v190_v37 = vsub.f32 %v376_v5, %v186_v34 }
  0xa6   :  { %v87_v38 = vmul.f32 %v85_v36, %v85_v36 }
  0xa7   :  { %v192_v39 = vmul.f32 %v190_v37, %v190_v37  ;;  %v131_v40 = vsel %vm48_vm0, %v129_v30, %v130_v35  ;;  %v184_v41 = vpop.permute.xlu0 %183 }
  0xa8   :  { %92 = vrot.lane.b32.xlu1 %v87_v38, %s333_s7  ;;  %v189_v42 = vsub.f32 %v374_v4, %v184_v41  ;;  %132 = vrot.lane.b32.xlu0 %v131_v40, %s333_s7  ;;  %v55_v47 = vpop.permute.xlu1 %54 }
  0xa9   :  { %v196_v43 = vrot.slane %v192_v39, 2  ;;  %v59_v62 = vsub.f32 %v376_v5, %v55_v47 }
  0xaa   :  { %v191_v44 = vmul.f32 %v189_v42, %v189_v42 }
  0xab   :  { %v53_v48 = vpop.permute.xlu0 %52  ;;  %v61_v7 = vmul.f32 %v59_v62, %v59_v62 }
  0xac   :  { %v195_v45 = vrot.slane %v191_v44, 2  ;;  %134 = vrot.lane.b32.xlu1 %v130_v35, %s333_s7  ;;  %175 = vrot.lane.b32.xlu0 %v174_v18, %s332_s1  ;;  %v101_v49 = vpop.permute.xlu1 %100  ;;  %v58_v56 = vsub.f32 %v374_v4, %v53_v48 }
  0xad   :  { %v105_v54 = vsub.f32 %v376_v5, %v101_v49 }
  0xae   :  { %v197_v46 = vsel %vm156_vm2, %v195_v45, %v196_v43  ;;  %v60_v63 = vmul.f32 %v58_v56, %v58_v56 }
  0xaf   :  { %v99_v50 = vpop.permute.xlu0 %98  ;;  %v107_v60 = vmul.f32 %v105_v54, %v105_v54 }
  0xb0   :  { %177 = vrot.lane.b32.xlu1 %v173_v17, %s332_s1  ;;  %198 = vrot.lane.b32.xlu0 %v197_v46, %s333_s7  ;;  %v73_v51 = vpop.permute.xlu1 %72  ;;  %v104_v55 = vsub.f32 %v374_v4, %v99_v50 }
  0xb1   :  { %v111_v3 = vrot.slane %v107_v60, 1  ;;  %v77_v14 = vadd.f32 %v73_v51, %v61_v7 }
  0xb2   :  { %v106_v61 = vmul.f32 %v104_v55, %v104_v55 }
  0xb3   :  { %v71_v52 = vpop.permute.xlu0 %70 }
  0xb4   :  { %200 = vrot.lane.b32.xlu1 %v196_v43, %s333_s7  ;;  %v147_v53 = vpop.permute.xlu1 %146  ;;  %v110_v6 = vrot.slane %v106_v61, 1  ;;  %v76_v8 = vadd.f32 %v71_v52, %v60_v63 }
  0xb5   :  { %v151_v59 = vsub.f32 %v376_v5, %v147_v53 }
  0xb7   :  { %v145_v57 = vpop.permute.xlu0 %144  ;;  %v153_v2 = vmul.f32 %v151_v59, %v151_v59 }
  0xb8   :  { %v150_v58 = vsub.f32 %v374_v4, %v145_v57  ;;  %v112_v4 = vsel %vm48_vm0, %v110_v6, %v111_v3 }
  0xb9   :  { %v158_v11 = vrot.slane %v153_v2, 2 }
  0xba   :  { %v152_v1 = vmul.f32 %v150_v58, %v150_v58 }
  0xbc   :  { %v157_v10 = vrot.slane %v152_v1, 2 }
  0xbe   :  { %v159_v18 = vsel %vm156_vm2, %v157_v10, %v158_v11 }
 0x116   :  { %v91_v12 = vpop.permute.xlu0 %90 }
 0x117   :  { %v96_v13 = vadd.f32 %v91_v12, %v76_v8 }
 0x119   :  { %v115_v15 = vadd.f32 %v112_v4, %v96_v13 }
 0x11a   :  { %v93_v17 = vpop.permute.xlu1 %92  ;;  %v133_v5 = vpop.permute.xlu0 %132 }
 0x11b   :  { %v97_v19 = vadd.f32 %v93_v17, %v77_v14  ;;  %v138_v20 = vadd.f32 %v133_v5, %v115_v15 }
 0x11d   :  { %v116_v21 = vadd.f32 %v111_v3, %v97_v19  ;;  %v162_v22 = vadd.f32 %v159_v18, %v138_v20 }
 0x11e   :  { %v135_v24 = vpop.permute.xlu1 %134  ;;  %v176_v25 = vpop.permute.xlu0 %175 }
 0x11f   :  { %v139_v26 = vadd.f32 %v135_v24, %v116_v21  ;;  %v181_v27 = vadd.f32 %v176_v25, %v162_v22 }
 0x121   :  { %v163_v28 = vadd.f32 %v158_v11, %v139_v26 }
 0x122   :  { %v178_v29 = vpop.permute.xlu1 %177  ;;  %v199_v30 = vpop.permute.xlu0 %198 }
 0x123   :  { %v204_v31 = vadd.f32 %v199_v30, %v181_v27  ;;  %v182_v32 = vadd.f32 %v178_v29, %v163_v28 }
 0x125   :  { %v224_v34 = vsel %vm223_vm5, %v204_v31, 0.0 }
 0x126   :  { %v201_v33 = vpop.permute.xlu1 %200  ;;  %v227_v37 = vsel %vm226_vm6, %v224_v34, 0.0 }
 0x127   :  { %v205_v35 = vadd.f32 %v201_v33, %v182_v32 }
 0x129   :  { %v225_v36 = vsel %vm223_vm5, %v205_v35, 0.0 }
 0x12a   :  { %v229_v38 = vsel %vm228_vm7, %v225_v36, 0.0 }
 0x12b   :  { %v230_v39 = vadd.f32 %v229_v38, %v227_v37 }
 0x12d   :  { %231 = vadd.xlane.f32.xlu0 %v230_v39 }
 0x1ba   :  { %v232_v40 = vpop.xlane.xlu0 %231 }
 0x1bb   :  { %v233_v41 = vrot.slane %v232_v40, 4 }
 0x1bd   :  { %v234_v42 = vadd.f32 %v233_v41, %v232_v40 }
 0x1bf   :  { %v235_v43 = vrot.slane %v234_v42, 2 }
 0x1c1   :  { %v236_v44 = vadd.f32 %v235_v43, %v234_v42 }
 0x1c3   :  { %v237_v45 = vrot.slane %v236_v44, 1 }
 0x1c5   :  { %v238_v46 = vadd.f32 %v237_v45, %v236_v44 }
 0x1c7   :  { %257 = vpush %v238_v46 }
 0x1f8   :  { %s258_s8 = spop %257 }
 0x1f9   :  { %241 = sst [smem:[#allocation7]] %s258_s8 }
 0x1fa   :  { %320 = shalt.err (!%p317_p4)
}
 0x1fb   :  { %s334_s16 = smov [#allocation7]  }
 0x1fc   :  { %249 = dma.smem_to_hbm %s334_s16, 16, %s432_s2, [#allocation4]  }
 0x1fd   :  { %325 = dma.done.wait [#allocation4], 16  }
 0x1fe   :  { %326 = vsyncadd [#allocation4], 4294967280 }
 0x1ff   :  { %253 = sfence }
 0x200   :  { %254 = vsyncpa [#allocation3], 1 }
 0x201   :  { %255 = vsyncpa [#allocation6], 1 }
 0x202   :  { %256 = vsyncpa [#allocation4], 1 }

</bundles_post_ra>
